<compile_context>
chip_gen: v7x
topology: tpu7x:2x2x1
jax: 0.10.0
libtpu: 0.0.40
codegen_flags: <defaults>
</compile_context>

<pallas_src>
import jax
import jax.numpy as jnp
from jax import lax
from jax.experimental import pallas as pl
from jax.experimental.pallas import tpu as pltpu


def _round_up(x, m):
    return ((x + m - 1) // m) * m


def _choose_tiles(batch_hint, in_dim, out_dim):
    """Tile sizes: lane-dense N, large K (few grid steps), modest M."""
    tm = min(_round_up(batch_hint, 16), 256)          # 16 rows = one packed bf16 vreg
    tk = min(_round_up(in_dim, 128), 2048)            # big K tile -> big weight DMAs
    tn = min(_round_up(out_dim, 128), 512)            # lane axis, unmasked stores
    # v7x megacore: if the M axis collapses to a single tile (small batch), try
    # to keep >= 2 tiles along N (the other "parallel" axis) so both
    # TensorCores get work.
    n_pad = _round_up(out_dim, 128)
    m_tiles = _round_up(batch_hint, tm) // tm
    if m_tiles == 1 and n_pad >= 256 and n_pad // tn < 2:
        tn = max(128, ((n_pad // 2) // 128) * 128)
    return tm, tn, tk


def _vmem_limit_bytes(vmem_need):
    """Generation-aware VMEM cap: ~75% of physical (48 MiB v7x, 96 MiB v5e/v6e)."""
    try:
        cap = int(pltpu.get_tpu_info().vmem_capacity_bytes)
    except Exception:
        cap = 64 << 20  # conservative (v7x-sized) fallback
    return min(max(2 * int(vmem_need), 32 << 20), (cap * 3) // 4)


def linear_kernel(x_ref, w_ref, b_ref, o_ref, acc_ref):
    """One (tm, tn) output tile; K reduction runs over grid axis 2.

    x_ref:   [tm, tk] activations (bf16)
    w_ref:   [tk, tn] weight tile in [K, N] layout (bf16) -- no in-kernel transpose
    b_ref:   [1,  tn] bias (f32), resident across k
    o_ref:   [tm, tn] output tile
    acc_ref: [tm, tn] f32 VMEM accumulator
    """
    k = pl.program_id(2)

    @pl.when(k == 0)
    def _():
        # Seed the accumulator with the broadcast bias -> no epilogue add.
        acc_ref[...] = jnp.broadcast_to(b_ref[...], acc_ref.shape).astype(jnp.float32)

    # y_tile += x_tile @ w_tile ; RHS contracts on its leading (sublane) axis so
    # the MXU consumes the weight directly.
    acc_ref[...] += lax.dot_general(
        x_ref[...], w_ref[...],
        dimension_numbers=(((1,), (0,)), ((), ())),
        preferred_element_type=jnp.float32)

    @pl.when(k == pl.num_programs(2) - 1)
    def _():
        o_ref[...] = acc_ref[...].astype(o_ref.dtype)


def prepare_linear_params(weight, bias, *, batch_hint=8, compute_dtype=jnp.bfloat16):
    """One-time (model-load) preprocessing of the Linear parameters.

    Transposes the PyTorch [out, in] weight to [K, N], zero-pads to tile
    multiples and casts to the compute dtype ONCE, so the per-call forward
    only has to touch the activations.
    """
    out_dim, in_dim = weight.shape
    tm, tn, tk = _choose_tiles(batch_hint, in_dim, out_dim)
    K = _round_up(in_dim, tk)
    N = _round_up(out_dim, tn)

    w_t = jnp.asarray(weight).T.astype(compute_dtype)          # [in, out] = [K', N']
    if (K, N) == (in_dim, out_dim):
        w_kn = w_t
    else:
        w_kn = jnp.zeros((K, N), compute_dtype).at[:in_dim, :out_dim].set(w_t)

    b_row = jnp.zeros((1, N), jnp.float32).at[0, :out_dim].set(
        jnp.asarray(bias).astype(jnp.float32))

    meta = dict(in_dim=in_dim, out_dim=out_dim, tn=tn, tk=tk, K=K, N=N,
                compute_dtype=compute_dtype)
    return w_kn, b_row, meta


def linear_pallas(x, w_kn, b_row, meta):
    """Forward pass: y = x @ W^T + b with pre-prepared [K, N] weight."""
    B, in_dim = x.shape
    assert in_dim == meta["in_dim"]
    compute_dtype = meta["compute_dtype"]
    out_dim = meta["out_dim"]
    tn, tk = meta["tn"], meta["tk"]
    K, N = meta["K"], meta["N"]
    out_dtype = x.dtype

    tm = min(_round_up(B, 16), 256)
    M = _round_up(B, tm)

    # Pad/cast activations only when actually needed (static Python check).
    if (M, K) == (B, in_dim) and x.dtype == compute_dtype:
        x_p = x
    else:
        x_p = jnp.zeros((M, K), compute_dtype).at[:B, :in_dim].set(
            x.astype(compute_dtype))

    grid = (M // tm, N // tn, K // tk)

    # Triple-buffer the streamed weight only when it is re-fetched over enough
    # grid steps to benefit (memory-bound small-batch regime).
    w_index_map = lambda i, j, k: (k, j)
    n_w_blocks = (N // tn) * (K // tk)
    if n_w_blocks >= 3:
        try:
            w_spec = pl.BlockSpec((tk, tn), w_index_map,
                                  pipeline_mode=pl.Buffered(3))
        except TypeError:  # older API without pipeline_mode
            w_spec = pl.BlockSpec((tk, tn), w_index_map)
    else:
        w_spec = pl.BlockSpec((tk, tn), w_index_map)

    cd_bytes = jnp.dtype(compute_dtype).itemsize
    out_bytes = jnp.dtype(out_dtype).itemsize
    vmem_need = (2 * tm * tk * cd_bytes          # x tiles (double-buffered)
                 + 3 * tk * tn * cd_bytes        # weight tiles (up to triple)
                 + 2 * tn * 4                    # bias
                 + 2 * tm * tn * out_bytes       # output tiles
                 + tm * tn * 4)                  # f32 accumulator

    cost = pl.CostEstimate(
        flops=2 * M * N * K,
        transcendentals=0,
        bytes_accessed=(M * K * cd_bytes * (N // tn)     # x re-read per N tile
                        + K * N * cd_bytes * (M // tm)   # W re-read per M tile
                        + N * 4 * (M // tm)              # bias
                        + M * N * out_bytes))            # output

    out_padded = pl.pallas_call(
        linear_kernel,
        out_shape=jax.ShapeDtypeStruct((M, N), out_dtype),
        grid=grid,
        in_specs=[
            pl.BlockSpec((tm, tk), lambda i, j, k: (i, k)),   # activations
            w_spec,                                           # weight in [K, N]
            pl.BlockSpec((1, tn), lambda i, j, k: (0, j)),    # bias row
        ],
        out_specs=pl.BlockSpec((tm, tn), lambda i, j, k: (i, j)),
        scratch_shapes=[pltpu.VMEM((tm, tn), jnp.float32)],
        compiler_params=pltpu.CompilerParams(
            dimension_semantics=("parallel", "parallel", "arbitrary"),
            vmem_limit_bytes=_vmem_limit_bytes(vmem_need)),
        cost_estimate=cost,
    )(x_p, w_kn, b_row)

    if (M, N) == (B, out_dim):
        return out_padded
    return out_padded[:B, :out_dim]


def external_linear(x, weight, bias):
    """Convenience one-shot wrapper (prep + forward). Prefer calling
    prepare_linear_params once at model load and linear_pallas per step."""
    w_kn, b_row, meta = prepare_linear_params(weight, bias, batch_hint=x.shape[0])
    return linear_pallas(x, w_kn, b_row, meta)


if __name__ == "__main__":
    # Small shapes consistent with the module's forward: net is [batch, in_dim].
    batch, in_dim, out_dim = 8, 32, 64

    key = jax.random.PRNGKey(0)
    kx, kw, kb = jax.random.split(key, 3)

    # Deterministic parameter init (PyTorch Linear-style uniform bound 1/sqrt(in_dim)).
    bound = 1.0 / (in_dim ** 0.5)
    weight = jax.random.uniform(kw, (out_dim, in_dim), jnp.float32, -bound, bound)
    bias = jax.random.uniform(kb, (out_dim,), jnp.float32, -bound, bound)
    x = jax.random.normal(kx, (batch, in_dim), jnp.float32)

    # One-time parameter preparation (model load), then the forward pass.
    w_kn, b_row, meta = prepare_linear_params(weight, bias, batch_hint=batch)
    out = linear_pallas(x, w_kn, b_row, meta)
    jax.block_until_ready(out)

    # Correctness check against plain JAX reference (bf16 operands, f32
    # accumulate -> looser tolerance than a pure-f32 path).
    ref = x @ weight.T + bias
    assert out.shape == (batch, out_dim)
    assert jnp.allclose(out, ref, atol=2e-2, rtol=2e-2), float(
        jnp.max(jnp.abs(out - ref)))

    print("KERNEL_OK")
</pallas_src>

<mosaic_0001>
module attributes {stable_mosaic.version = 11 : i64} {
  func.func @linear_kernel(%arg0: i32, %arg1: i32, %arg2: i32, %arg3: memref<16x128xbf16, #tpu.memory_space<vmem>>, %arg4: memref<128x128xbf16, #tpu.memory_space<vmem>>, %arg5: memref<1x128xf32, #tpu.memory_space<vmem>>, %arg6: memref<16x128xf32, #tpu.memory_space<vmem>>, %arg7: memref<16x128xf32, #tpu.memory_space<vmem>>) attributes {dimension_semantics = [#tpu.dimension_semantics<parallel>, #tpu.dimension_semantics<parallel>, #tpu.dimension_semantics<arbitrary>], iteration_bounds = array<i64: 1, 1, 1>, scalar_prefetch = 0 : i64, scratch_operands = 1 : i64, tpu.core_type = #tpu.core_type<tc>, window_params = [{transform_indices = @transform_0, window_bounds = array<i64: 16, 128>}, {transform_indices = @transform_1, window_bounds = array<i64: 128, 128>}, {transform_indices = @transform_2, window_bounds = array<i64: 1, 128>}, {transform_indices = @transform_3, window_bounds = array<i64: 16, 128>}]} {
    %c0_i32 = arith.constant 0 : i32
    %0 = arith.cmpi eq, %arg2, %c0_i32 : i32
    %1 = arith.extui %0 : i1 to i32
    %c0_i32_0 = arith.constant 0 : i32
    %2 = arith.cmpi ne, %1, %c0_i32_0 : i32
    scf.if %2 {
      %c0_10 = arith.constant 0 : index
      %c0_11 = arith.constant 0 : index
      %12 = vector.load %arg5[%c0_10, %c0_11] : memref<1x128xf32, #tpu.memory_space<vmem>>, vector<1x128xf32>
      %13 = vector.shape_cast %12 : vector<1x128xf32> to vector<1x128xf32>
      %14 = vector.broadcast %13 : vector<1x128xf32> to vector<16x128xf32>
      %c0_12 = arith.constant 0 : index
      %c0_13 = arith.constant 0 : index
      %15 = vector.load %arg7[%c0_12, %c0_13] : memref<16x128xf32, #tpu.memory_space<vmem>>, vector<16x128xf32>
      tpu.vector_store %arg7[%c0_12, %c0_13], %14 {strides = array<i32>} : memref<16x128xf32, #tpu.memory_space<vmem>>, vector<16x128xf32>,
    } else {
    }
    %c0 = arith.constant 0 : index
    %c0_1 = arith.constant 0 : index
    %3 = vector.load %arg7[%c0, %c0_1] : memref<16x128xf32, #tpu.memory_space<vmem>>, vector<16x128xf32>
    %c0_2 = arith.constant 0 : index
    %c0_3 = arith.constant 0 : index
    %4 = vector.load %arg3[%c0_2, %c0_3] : memref<16x128xbf16, #tpu.memory_space<vmem>>, vector<16x128xbf16>
    %c0_4 = arith.constant 0 : index
    %c0_5 = arith.constant 0 : index
    %5 = vector.load %arg4[%c0_4, %c0_5] : memref<128x128xbf16, #tpu.memory_space<vmem>>, vector<128x128xbf16>
    %cst = arith.constant dense<0.000000e+00> : vector<16x128xf32>
    %6 = tpu.matmul %4, %5, %cst {dimension_numbers = #tpu.dot_dimension_numbers<[1], [0], [0], [1], [0, 0, 1, 1], [], []>} : vector<16x128xbf16>, vector<128x128xbf16>, vector<16x128xf32> -> vector<16x128xf32>
    %7 = arith.addf %3, %6 : vector<16x128xf32>
    %c0_6 = arith.constant 0 : index
    %c0_7 = arith.constant 0 : index
    %8 = vector.load %arg7[%c0_6, %c0_7] : memref<16x128xf32, #tpu.memory_space<vmem>>, vector<16x128xf32>
    tpu.vector_store %arg7[%c0_6, %c0_7], %7 {strides = array<i32>} : memref<16x128xf32, #tpu.memory_space<vmem>>, vector<16x128xf32>,
    %c0_i32_8 = arith.constant 0 : i32
    %9 = arith.cmpi eq, %arg2, %c0_i32_8 : i32
    %10 = arith.extui %9 : i1 to i32
    %c0_i32_9 = arith.constant 0 : i32
    %11 = arith.cmpi ne, %10, %c0_i32_9 : i32
    scf.if %11 {
      %c0_10 = arith.constant 0 : index
      %c0_11 = arith.constant 0 : index
      %12 = vector.load %arg7[%c0_10, %c0_11] : memref<16x128xf32, #tpu.memory_space<vmem>>, vector<16x128xf32>
      %c0_12 = arith.constant 0 : index
      %c0_13 = arith.constant 0 : index
      %13 = vector.load %arg6[%c0_12, %c0_13] : memref<16x128xf32, #tpu.memory_space<vmem>>, vector<16x128xf32>
      tpu.vector_store %arg6[%c0_12, %c0_13], %12 {strides = array<i32>} : memref<16x128xf32, #tpu.memory_space<vmem>>, vector<16x128xf32>,
    } else {
    }
    return
  }
  func.func @transform_0(%arg0: i32, %arg1: i32, %arg2: i32) -> (i32, i32) {
    %c0_i32 = arith.constant 0 : i32
    return %arg0, %arg2 : i32, i32
  }
  func.func @transform_1(%arg0: i32, %arg1: i32, %arg2: i32) -> (i32, i32) {
    %c0_i32 = arith.constant 0 : i32
    return %arg2, %arg1 : i32, i32
  }
  func.func @transform_2(%arg0: i32, %arg1: i32, %arg2: i32) -> (i32, i32) {
    %c0_i32 = arith.constant 0 : i32
    %c0_i32_0 = arith.constant 0 : i32
    return %c0_i32, %arg1 : i32, i32
  }
  func.func @transform_3(%arg0: i32, %arg1: i32, %arg2: i32) -> (i32, i32) {
    %c0_i32 = arith.constant 0 : i32
    return %arg0, %arg1 : i32, i32
  }
}

</mosaic_0001>

<bundles_post_ra>
// kernel: tpu_custom_call.1
= control target key start
LH: loop header
LB: loop body
LE: loop exit
PB: predicated region body
PF: predicated region fallthrough
CT: control target
= control target key end

     0   :  { %8 = vsyncpa [#allocation4], 0  ;;  %s398_s0 = inlined_call_operand.hbm [shape: bf16[16,128], index: 0, kind: input, shape index: {}]   ;;  %s399_s1 = inlined_call_operand.hbm [shape: bf16[128,128], index: 1, kind: input, shape index: {}]   ;;  %s400_s2 = inlined_call_operand.vmem [shape: f32[1,128], index: 2, kind: input, shape index: {}]   ;;  %s401_s3 = inlined_call_operand.hbm [shape: f32[16,128], index: 3, kind: output, shape index: {}]  }
   0x1   :  { %9 = vsyncpa [#allocation7], 0 }
   0x2   :  { %10 = vsyncpa [#allocation5], 0  ;;  %s330_s12 = smov [#allocation3]   ;;  %s258_s16 = scalar_lea.hbm %s398_s0, 128 }
   0x3   :  { %s16_s13 = sshll.u32 %s330_s12, 4  ;;  %p259_p0 = scmp.ne.s32.totalorder %s398_s0, %s258_s16  ;;  %s17_s13 = int_to_ptr.vmem [resolvable:$true] %s16_s13 }
   0x4   :  { %p262_p1 = scmp.lt.u32.totalorder %s258_s16, %s398_s0 }
   0x6   :  { %p264_p2 = pnand %p262_p1, %p259_p0 }
   0x8   :  { %267 = shalt.err (!%p264_p2)
}
   0x9   :  { %s268_s21 = scalar_lea.vmem %s17_s13, 128  ;;  %p273_p4 = scmp.lt.s32.totalorder %s17_s13, %s17_s13 }
   0xa   :  { %p269_p3 = scmp.ne.s32.totalorder %s17_s13, %s268_s21  ;;  %p274_p5 = scmp.lt.s32.totalorder %s268_s21, %s268_s21 }
   0xc   :  { %p275_p6 = por %p274_p5, %p273_p4 }
   0xe   :  { %p276_p7 = pnand %p275_p6, %p269_p3 }
  0x10   :  { %279 = shalt.err (!%p276_p7)
}
  0x11   :  { %s331_s22 = smov 64   ;;  %s332_s23 = smov 4  }
  0x12   :  { %22 = dma.hbm_to_vmem [thread:$0]  %s398_s0, 128, %s17_s13, [#allocation4], %s331_s22, %s331_s22, %s332_s23  }
  0x13   :  { %s333_s26 = smov [#allocation6]   ;;  %s280_s30 = scalar_lea.hbm %s399_s1, 1024 }
  0x14   :  { %s28_s27 = sshll.u32 %s333_s26, 4  ;;  %p281_p8 = scmp.ne.s32.totalorder %s399_s1, %s280_s30  ;;  %s29_s27 = int_to_ptr.vmem [resolvable:$true] %s28_s27 }
  0x15   :  { %p284_p9 = scmp.lt.u32.totalorder %s280_s30, %s399_s1 }
  0x17   :  { %p286_p10 = pnand %p284_p9, %p281_p8 }
  0x19   :  { %289 = shalt.err (!%p286_p10)
}
  0x1a   :  { %s290_s8 = scalar_lea.vmem %s29_s27, 1024  ;;  %p295_p12 = scmp.lt.s32.totalorder %s29_s27, %s29_s27 }
  0x1b   :  { %p291_p11 = scmp.ne.s32.totalorder %s29_s27, %s290_s8  ;;  %p296_p13 = scmp.lt.s32.totalorder %s290_s8, %s290_s8 }
  0x1d   :  { %p297_p0 = por %p296_p13, %p295_p12 }
  0x1f   :  { %p298_p1 = pnand %p297_p0, %p291_p11 }
  0x21   :  { %301 = shalt.err (!%p298_p1)
}
  0x22   :  { %34 = dma.hbm_to_vmem [thread:$0]  %s399_s1, 1024, %s29_s27, [#allocation7], %s331_s22, %s331_s22, %s332_s23  }
  0x23   :  { %324 = dma.done.wait [#allocation4], 128  }
  0x24   :  { %325 = vsyncadd [#allocation4], 4294967168 }
  0x25   :  { %326 = dma.done.wait [#allocation7], 1024  }
  0x26   :  { %327 = vsyncadd [#allocation7], 4294966272  ;;  %v334_v0 = vmov 0.0   ;;  %vm335_vm0 = vmmov 0   ;;  %v249_v1 = vld [vmem:[#allocation6] sm:$0xff]   ;;  %v250_v2 = vld [vmem:[#allocation6 + $0x8] sm:$0xff]  }
  0x27   :  { %220 = vmatprep.subr.bf16.mxu0 %v334_v0  ;;  %236 = vmatprep.mubr.msk.bf16.mxu0 %vm335_vm0, %v334_v0  ;;  %v251_v3 = vld [vmem:[#allocation6 + $0x10] sm:$0xff]   ;;  %v252_v4 = vld [vmem:[#allocation6 + $0x18] sm:$0xff]   ;;  %v253_v5 = vld [vmem:[#allocation6 + $0x20] sm:$0xff]   ;;  %s336_s11 = smov [#allocation8]  }
  0x28   :  { %221 = vmatpush3.bf16.msra.mxu0 %v249_v1  ;;  %v254_v6 = vld [vmem:[#allocation6 + $0x28] sm:$0xff]   ;;  %v255_v7 = vld [vmem:[#allocation6 + $0x30] sm:$0xff]   ;;  %v256_v8 = vld [vmem:[#allocation6 + $0x38] sm:$0xff]   ;;  %s188_s12 = sshll.u32 %s336_s11, 4  ;;  %s189_s12 = int_to_ptr.vmem [resolvable:$true] %s188_s12 }
  0x29   :  { %222 = vmatprep.subr.bf16.mxu0 %v334_v0  ;;  %v257_v9 = vld [vmem:[#allocation3] sm:$0xff]   ;;  %s302_s13 = scalar_lea.vmem %s189_s12, 256  ;;  %p307_p3 = scmp.lt.s32.totalorder %s189_s12, %s189_s12 }
  0x2a   :  { %v201_v10 = vld [vmem:[%s400_s2] ss:$0 sm:$0xff]  ;;  %p303_p2 = scmp.ne.s32.totalorder %s189_s12, %s302_s13  ;;  %p308_p4 = scmp.lt.s32.totalorder %s302_s13, %s302_s13 }
  0x2c   :  { %223 = vmatpush3.bf16.msra.mxu0 %v250_v2  ;;  %p309_p5 = por %p308_p4, %p307_p3 }
  0x2d   :  { %224 = vmatprep.subr.bf16.mxu0 %v334_v0 }
  0x2e   :  { %p310_p6 = pnand %p309_p5, %p303_p2 }
  0x30   :  { %225 = vmatpush3.bf16.msra.mxu0 %v251_v3 }
  0x31   :  { %226 = vmatprep.subr.bf16.mxu0 %v334_v0 }
  0x34   :  { %227 = vmatpush3.bf16.msra.mxu0 %v252_v4 }
  0x35   :  { %228 = vmatprep.subr.bf16.mxu0 %v334_v0 }
  0x38   :  { %229 = vmatpush3.bf16.msra.mxu0 %v253_v5 }
  0x39   :  { %230 = vmatprep.subr.bf16.mxu0 %v334_v0 }
  0x3c   :  { %231 = vmatpush3.bf16.msra.mxu0 %v254_v6 }
  0x3d   :  { %232 = vmatprep.subr.bf16.mxu0 %v334_v0 }
  0x40   :  { %233 = vmatpush3.bf16.msra.mxu0 %v255_v7 }
  0x41   :  { %234 = vmatprep.subr.bf16.mxu0 %v334_v0 }
  0x44   :  { %235 = vmatpush3.bf16.msra.mxu0 %v256_v8 }
  0x47   :  { %237 = vmatmul.mubr.bf16.vlgmr.msra.gmra.mrb[0].mxu0 %v257_v9 }
 0x11a   :  { %v165_v11 = vpop.f32.mrb[0].mxu0 }
 0x11b   :  { %v172_v12 = vadd.f32 %v201_v10, %v165_v11  ;;  %v238_v13 = vpop.f32.mrb[1].mxu0 }
 0x11c   :  { %v168_v14 = vpop.f32.mrb[2].mxu0 }
 0x11d   :  { %181 = vst [vmem:[#allocation8] sm:$0xff] %v172_v12  ;;  %v173_v15 = vadd.f32 %v201_v10, %v168_v14  ;;  %v239_v16 = vpop.f32.mrb[3].mxu0 }
 0x11f   :  { %182 = vst [vmem:[#allocation8 + $0x8] sm:$0xff] %v173_v15 }
 0x120   :  { %313 = shalt.err (!%p310_p6)
}
 0x121   :  { %s314_s15 = scalar_lea.hbm %s401_s3, 256 }
 0x122   :  { %p315_p7 = scmp.ne.s32.totalorder %s401_s3, %s314_s15  ;;  %p318_p8 = scmp.lt.u32.totalorder %s314_s15, %s401_s3 }
 0x124   :  { %p320_p9 = pnand %p318_p8, %p315_p7 }
 0x126   :  { %323 = shalt.err (!%p320_p9)
}
 0x127   :  { %s337_s20 = smov 128   ;;  %s338_s21 = smov 8  }
 0x128   :  { %194 = dma.vmem_to_hbm [thread:$0]  %s189_s12, 256, %s401_s3, [#allocation5], %s337_s20, %s337_s20, %s338_s21  }
 0x129   :  { %328 = dma.done.wait [#allocation5], 256  }
 0x12a   :  { %329 = vsyncadd [#allocation5], 4294967040 }
 0x12b   :  { %198 = vsyncpa [#allocation4], 1 }
 0x12c   :  { %199 = vsyncpa [#allocation7], 1 }
 0x12d   :  { %200 = vsyncpa [#allocation5], 1 }

</bundles_post_ra>
